<compile_context>
chip_gen: v6e
topology: v6e:2x2x1
jax: 0.10.0
libtpu: 0.0.40
codegen_flags: <defaults>
</compile_context>

<pallas_src>
import jax
import jax.numpy as jnp
from jax.experimental import pallas as pl
from jax.experimental.pallas import tpu as pltpu


def _round_up(x, m):
    return ((x + m - 1) // m) * m


# ------------------------------ Pallas kernel -------------------------------

def _proposal_laplace_kernel(x_ref, w1_ref, b1_ref, w2_ref, b2_ref,
                             scale2_ref, offset2_ref, o_ref):
    # lin1 + bias + ReLU (MXU dot, f32 accumulate) -- all resident in VMEM.
    h = jnp.dot(x_ref[...], w1_ref[...], preferred_element_type=jnp.float32)
    h = jnp.maximum(h + b1_ref[...], 0.0)

    # lin2 + bias -> (tm, 2): column 0 = raw location, column 1 = raw scale.
    y = jnp.dot(h, w2_ref[...], preferred_element_type=jnp.float32) + b2_ref[...]

    # Numerically stable softplus over the WHOLE (tm, 2) tile; the spare exp
    # on column 0 is free (EUP slot), and we avoid lane-slicing / concat on a
    # lane-sparse tile.
    sp = jnp.maximum(y, 0.0) + jnp.log1p(jnp.exp(-jnp.abs(y)))
    col = jax.lax.broadcasted_iota(jnp.int32, y.shape, dimension=1)
    z = jnp.where(col == 0, y, sp)          # col 0: raw loc, col 1: softplus

    # Prior affine transform: scale2 = [ps, ps], offset2 = [p_loc, 0].
    out = z * scale2_ref[...] + offset2_ref[...]
    o_ref[...] = out.astype(o_ref.dtype)


# ------------------------------ Python wrapper -------------------------------

def proposal_laplace_forward(x, prior_locations, prior_scales, params,
                             tile_m=2048):
    """Returns (True, (B, 2) array): [loc * prior_scale + prior_loc,
                                      softplus(raw_scale) * prior_scale]."""
    B, D = x.shape
    # PyTorch Linear stores (out, in); pre-transpose once so the kernel does
    # row-major (M, K) @ (K, N) on the MXU.
    w1t = params['lin1_w'].T.astype(jnp.float32)          # (D, D)
    b1 = params['lin1_b'].reshape(1, D).astype(jnp.float32)
    w2t = params['lin2_w'].T.astype(jnp.float32)          # (D, 2)
    b2 = params['lin2_b'].reshape(1, 2).astype(jnp.float32)

    # TODO(synk): nn.Dropout(p=0) is the identity (eval / p=0); stochastic
    # dropout for p>0 is not modelled.

    # Pre-stack priors into (B, 2) arrays matching the output block layout.
    ps = prior_scales.astype(jnp.float32)
    ploc = prior_locations.astype(jnp.float32)
    scale2 = jnp.stack([ps, ps], axis=1)                          # (B, 2)
    offset2 = jnp.stack([ploc, jnp.zeros_like(ploc)], axis=1)     # (B, 2)

    # Large batch tile (HBM/overhead-bound kernel). Cap so a large batch still
    # produces >= 2 grid steps (v7x has 2 TensorCores). x tile is tm*D*4 bytes,
    # i.e. 256 KiB at tm=2048, D=32 -- trivially within VMEM on all chips.
    tm = min(tile_m, max(8, _round_up(pl.cdiv(B, 2), 8)))
    grid = (pl.cdiv(B, tm),)   # ragged last block: Pallas masks OOB rows

    out = pl.pallas_call(
        _proposal_laplace_kernel,
        out_shape=jax.ShapeDtypeStruct((B, 2), jnp.float32),
        grid=grid,
        in_specs=[
            pl.BlockSpec((tm, D), lambda i: (i, 0)),   # x tile (native dtype)
            pl.BlockSpec((D, D), lambda i: (0, 0)),    # lin1 weight (resident)
            pl.BlockSpec((1, D), lambda i: (0, 0)),    # lin1 bias
            pl.BlockSpec((D, 2), lambda i: (0, 0)),    # lin2 weight
            pl.BlockSpec((1, 2), lambda i: (0, 0)),    # lin2 bias
            pl.BlockSpec((tm, 2), lambda i: (i, 0)),   # prior scale (stacked)
            pl.BlockSpec((tm, 2), lambda i: (i, 0)),   # prior offset (stacked)
        ],
        out_specs=pl.BlockSpec((tm, 2), lambda i: (i, 0)),
        compiler_params=pltpu.CompilerParams(
            dimension_semantics=("parallel",)),
    )(x, w1t, b1, w2t, b2, scale2, offset2)

    return True, out


# ----------------------------- reference & init ------------------------------

def _reference_forward(x, prior_locations, prior_scales, params):
    xf = x.astype(jnp.float32)
    h = jnp.maximum(xf @ params['lin1_w'].T + params['lin1_b'], 0.0)
    y = h @ params['lin2_w'].T + params['lin2_b']
    loc = y[:, 0:1]
    scale = jax.nn.softplus(y[:, 1:2])
    p_scale = prior_scales.reshape(-1, 1).astype(jnp.float32)
    p_loc = prior_locations.reshape(-1, 1).astype(jnp.float32)
    return jnp.concatenate([loc * p_scale + p_loc, scale * p_scale], axis=1)


def init_params(key, input_dim):
    k1, k2, k3, k4 = jax.random.split(key, 4)
    # Approximation of xavier_uniform (gain handling omitted for the test).
    lim1 = (6.0 / (input_dim + input_dim)) ** 0.5
    lim2 = (6.0 / (input_dim + 2)) ** 0.5
    return {
        'lin1_w': jax.random.uniform(k1, (input_dim, input_dim), jnp.float32,
                                     -lim1, lim1),
        'lin1_b': jax.random.uniform(k2, (input_dim,), jnp.float32, -0.1, 0.1),
        'lin2_w': jax.random.uniform(k3, (2, input_dim), jnp.float32,
                                     -lim2, lim2),
        'lin2_b': jax.random.uniform(k4, (2,), jnp.float32, -0.1, 0.1),
    }


if __name__ == "__main__":
    key = jax.random.PRNGKey(0)
    kx, kl, ks, kp = jax.random.split(key, 4)

    B, input_dim = 8, 32
    x = jax.random.normal(kx, (B, input_dim), jnp.float32)
    # In PyTorch these come from `samples[i].distribution.prior_{location,scale}`;
    # here they are plain per-sample arrays.
    prior_locations = jax.random.normal(kl, (B,), jnp.float32)
    prior_scales = jax.random.uniform(ks, (B,), jnp.float32, 0.5, 2.0)

    params = init_params(kp, input_dim)

    fwd = jax.jit(proposal_laplace_forward)
    ok_flag, out = fwd(x, prior_locations, prior_scales, params)
    out = jax.block_until_ready(out)

    assert out.shape == (B, 2), out.shape
    assert bool(jnp.all(jnp.isfinite(out)))
    # scales * prior_scales must be positive
    assert bool(jnp.all(out[:, 1] > 0.0))

    ref = _reference_forward(x, prior_locations, prior_scales, params)
    assert bool(jnp.allclose(out, ref, atol=2e-3, rtol=2e-3))

    print("KERNEL_OK")
</pallas_src>

<mosaic_0001>
module attributes {stable_mosaic.version = 11 : i64} {
  func.func @_proposal_laplace_kernel(%arg0: i32, %arg1: memref<8x32xf32, #tpu.memory_space<vmem>>, %arg2: memref<32x32xf32, #tpu.memory_space<vmem>>, %arg3: memref<1x32xf32, #tpu.memory_space<vmem>>, %arg4: memref<32x2xf32, #tpu.memory_space<vmem>>, %arg5: memref<1x2xf32, #tpu.memory_space<vmem>>, %arg6: memref<8x2xf32, #tpu.memory_space<vmem>>, %arg7: memref<8x2xf32, #tpu.memory_space<vmem>>, %arg8: memref<8x2xf32, #tpu.memory_space<vmem>>) attributes {dimension_semantics = [#tpu.dimension_semantics<parallel>], iteration_bounds = array<i64: 1>, scalar_prefetch = 0 : i64, scratch_operands = 0 : i64, tpu.core_type = #tpu.core_type<tc>, window_params = [{transform_indices = @transform_0, window_bounds = array<i64: 8, 32>}, {pipeline_mode = #tpu.pipeline_mode<synchronous>, transform_indices = @transform_1, window_bounds = array<i64: 32, 32>}, {pipeline_mode = #tpu.pipeline_mode<synchronous>, transform_indices = @transform_2, window_bounds = array<i64: 1, 32>}, {pipeline_mode = #tpu.pipeline_mode<synchronous>, transform_indices = @transform_3, window_bounds = array<i64: 32, 2>}, {pipeline_mode = #tpu.pipeline_mode<synchronous>, transform_indices = @transform_4, window_bounds = array<i64: 1, 2>}, {transform_indices = @transform_5, window_bounds = array<i64: 8, 2>}, {transform_indices = @transform_6, window_bounds = array<i64: 8, 2>}, {transform_indices = @transform_7, window_bounds = array<i64: 8, 2>}]} {
    %c0 = arith.constant 0 : index
    %c0_0 = arith.constant 0 : index
    %0 = vector.load %arg1[%c0, %c0_0] : memref<8x32xf32, #tpu.memory_space<vmem>>, vector<8x32xf32>
    %c0_1 = arith.constant 0 : index
    %c0_2 = arith.constant 0 : index
    %1 = vector.load %arg2[%c0_1, %c0_2] : memref<32x32xf32, #tpu.memory_space<vmem>>, vector<32x32xf32>
    %cst = arith.constant dense<0.000000e+00> : vector<8x32xf32>
    %2 = tpu.matmul %0, %1, %cst {dimension_numbers = #tpu.dot_dimension_numbers<[1], [0], [0], [1], [0, 0, 1, 1], [], []>} : vector<8x32xf32>, vector<32x32xf32>, vector<8x32xf32> -> vector<8x32xf32>
    %c0_3 = arith.constant 0 : index
    %c0_4 = arith.constant 0 : index
    %3 = vector.load %arg3[%c0_3, %c0_4] : memref<1x32xf32, #tpu.memory_space<vmem>>, vector<1x32xf32>
    %4 = vector.broadcast %3 : vector<1x32xf32> to vector<8x32xf32>
    %5 = arith.addf %2, %4 : vector<8x32xf32>
    %cst_5 = arith.constant 0.000000e+00 : f32
    %6 = vector.broadcast %cst_5 : f32 to vector<8x32xf32>
    %7 = arith.maximumf %5, %6 : vector<8x32xf32>
    %c0_6 = arith.constant 0 : index
    %c0_7 = arith.constant 0 : index
    %8 = vector.load %arg4[%c0_6, %c0_7] : memref<32x2xf32, #tpu.memory_space<vmem>>, vector<32x2xf32>
    %cst_8 = arith.constant dense<0.000000e+00> : vector<8x2xf32>
    %9 = tpu.matmul %7, %8, %cst_8 {dimension_numbers = #tpu.dot_dimension_numbers<[1], [0], [0], [1], [0, 0, 1, 1], [], []>} : vector<8x32xf32>, vector<32x2xf32>, vector<8x2xf32> -> vector<8x2xf32>
    %c0_9 = arith.constant 0 : index
    %c0_10 = arith.constant 0 : index
    %10 = vector.load %arg5[%c0_9, %c0_10] : memref<1x2xf32, #tpu.memory_space<vmem>>, vector<1x2xf32>
    %11 = vector.broadcast %10 : vector<1x2xf32> to vector<8x2xf32>
    %12 = arith.addf %9, %11 : vector<8x2xf32>
    %cst_11 = arith.constant 0.000000e+00 : f32
    %13 = vector.broadcast %cst_11 : f32 to vector<8x2xf32>
    %14 = arith.maximumf %12, %13 : vector<8x2xf32>
    %15 = math.absf %12 : vector<8x2xf32>
    %cst_12 = arith.constant 0.000000e+00 : f32
    %16 = vector.broadcast %cst_12 : f32 to vector<8x2xf32>
    %17 = arith.subf %16, %15 : vector<8x2xf32>
    %18 = math.exp %17 : vector<8x2xf32>
    %19 = math.log1p %18 : vector<8x2xf32>
    %20 = arith.addf %14, %19 : vector<8x2xf32>
    %21 = tpu.iota {dimensions = array<i32: 1>} : vector<8x2xi32>
    %c0_i32 = arith.constant 0 : i32
    %22 = vector.broadcast %c0_i32 : i32 to vector<8x2xi32>
    %23 = arith.cmpi eq, %21, %22 : vector<8x2xi32>
    %24 = arith.select %23, %12, %20 : vector<8x2xi1>, vector<8x2xf32>
    %c0_13 = arith.constant 0 : index
    %c0_14 = arith.constant 0 : index
    %25 = vector.load %arg6[%c0_13, %c0_14] : memref<8x2xf32, #tpu.memory_space<vmem>>, vector<8x2xf32>
    %26 = arith.mulf %24, %25 : vector<8x2xf32>
    %c0_15 = arith.constant 0 : index
    %c0_16 = arith.constant 0 : index
    %27 = vector.load %arg7[%c0_15, %c0_16] : memref<8x2xf32, #tpu.memory_space<vmem>>, vector<8x2xf32>
    %28 = arith.addf %26, %27 : vector<8x2xf32>
    %c0_17 = arith.constant 0 : index
    %c0_18 = arith.constant 0 : index
    %29 = vector.load %arg8[%c0_17, %c0_18] : memref<8x2xf32, #tpu.memory_space<vmem>>, vector<8x2xf32>
    tpu.vector_store %arg8[%c0_17, %c0_18], %28 {strides = array<i32>} : memref<8x2xf32, #tpu.memory_space<vmem>>, vector<8x2xf32>,
    return
  }
  func.func @transform_0(%arg0: i32) -> (i32, i32) {
    %c0_i32 = arith.constant 0 : i32
    %c0_i32_0 = arith.constant 0 : i32
    return %arg0, %c0_i32 : i32, i32
  }
  func.func @transform_1(%arg0: i32) -> (i32, i32) {
    %c0_i32 = arith.constant 0 : i32
    %c0_i32_0 = arith.constant 0 : i32
    %c0_i32_1 = arith.constant 0 : i32
    return %c0_i32, %c0_i32_0 : i32, i32
  }
  func.func @transform_2(%arg0: i32) -> (i32, i32) {
    %c0_i32 = arith.constant 0 : i32
    %c0_i32_0 = arith.constant 0 : i32
    %c0_i32_1 = arith.constant 0 : i32
    return %c0_i32, %c0_i32_0 : i32, i32
  }
  func.func @transform_3(%arg0: i32) -> (i32, i32) {
    %c0_i32 = arith.constant 0 : i32
    %c0_i32_0 = arith.constant 0 : i32
    %c0_i32_1 = arith.constant 0 : i32
    return %c0_i32, %c0_i32_0 : i32, i32
  }
  func.func @transform_4(%arg0: i32) -> (i32, i32) {
    %c0_i32 = arith.constant 0 : i32
    %c0_i32_0 = arith.constant 0 : i32
    %c0_i32_1 = arith.constant 0 : i32
    return %c0_i32, %c0_i32_0 : i32, i32
  }
  func.func @transform_5(%arg0: i32) -> (i32, i32) {
    %c0_i32 = arith.constant 0 : i32
    %c0_i32_0 = arith.constant 0 : i32
    return %arg0, %c0_i32 : i32, i32
  }
  func.func @transform_6(%arg0: i32) -> (i32, i32) {
    %c0_i32 = arith.constant 0 : i32
    %c0_i32_0 = arith.constant 0 : i32
    return %arg0, %c0_i32 : i32, i32
  }
  func.func @transform_7(%arg0: i32) -> (i32, i32) {
    %c0_i32 = arith.constant 0 : i32
    %c0_i32_0 = arith.constant 0 : i32
    return %arg0, %c0_i32 : i32, i32
  }
}

</mosaic_0001>

<bundles_post_ra>
// kernel: proposal_laplace_forward.1
= control target key start
LH: loop header
LB: loop body
LE: loop exit
PB: predicated region body
PF: predicated region fallthrough
CT: control target
= control target key end

     0   :  { %v268_v0 = vmov 0.0   ;;  %vm269_vm0 = vmmov 0   ;;  %vm38_vm1 = vcmask 261120   ;;  %v212_v25 = vlaneseq  ;;  %s354_s1 = inlined_call_operand.vmem [shape: f32[32,32], index: 1, kind: input, shape index: {}]   ;;  %s355_s3 = inlined_call_operand.vmem [shape: f32[32,2], index: 3, kind: input, shape index: {}]   ;;  %s356_s0 = inlined_call_operand.vmem [shape: f32[8,32], index: 0, kind: input, shape index: {}]   ;;  %s357_s2 = inlined_call_operand.vmem [shape: f32[1,32], index: 2, kind: input, shape index: {}]   ;;  %s358_s4 = inlined_call_operand.vmem [shape: f32[1,2], index: 4, kind: input, shape index: {}]   ;;  %s359_s5 = inlined_call_operand.vmem [shape: f32[8,2], index: 5, kind: input, shape index: {}]   ;;  %s360_s6 = inlined_call_operand.vmem [shape: f32[8,2], index: 6, kind: input, shape index: {}]   ;;  %s361_s7 = inlined_call_operand.vmem [shape: f32[8,2], index: 7, kind: output, shape index: {}]  }
   0x1   :  { %240 = vmatprep.subr.mxu0 %v268_v0  ;;  %v30_v1 = vld [vmem:[%s354_s1 + $0x18] sm:$0xff]  ;;  %v29_v2 = vld [vmem:[%s354_s1 + $0x10] sm:$0xff]  ;;  %248 = vmatprep.mubr.msk.f32.mxu0 %vm269_vm0, %v268_v0  ;;  %v28_v4 = vld [vmem:[%s354_s1 + $0x8] sm:$0xff]  ;;  %vm220_vm4 = vcmask 15360  }
   0x2   :  { %241 = vmatpush3.msra.mxu0 %v30_v1  ;;  %251 = vmatprep.subr.mxu1 %v268_v0  ;;  %v116_v3 = vld [vmem:[%s355_s3 + $0x18] sm:$0xff]  ;;  %v27_v5 = vld [vmem:[%s354_s1] sm:$0xff]  ;;  %v115_v7 = vld [vmem:[%s355_s3 + $0x10] sm:$0xff]  ;;  %v213_v28 = vand.u32 127, %v212_v25 }
   0x3   :  { %242 = vmatprep.subr.mxu0 %v268_v0  ;;  %252 = vmatpush3.msra.mxu1 %v116_v3  ;;  %v26_v6 = vld [vmem:[%s356_s0] sm:$0xff]  ;;  %v114_v8 = vld [vmem:[%s355_s3 + $0x8] sm:$0xff] }
   0x4   :  { %243 = vmatpush3.msra.mxu0 %v29_v2  ;;  %253 = vmatprep.subr.mxu1 %v268_v0  ;;  %v113_v9 = vld [vmem:[%s355_s3] sm:$0xff]  ;;  %vm214_vm3 = vcmp.eq.s32.totalorder %v213_v28, 0 }
   0x5   :  { %244 = vmatprep.subr.mxu0 %v268_v0  ;;  %259 = vmatprep.mubr.msk.f32.mxu1 %vm269_vm0, %v268_v0  ;;  %v226_v10 = vld [vmem:[%s357_s2] ss:$0 sm:$0xff] }
   0x6   :  { %245 = vmatpush3.msra.mxu0 %v28_v4  ;;  %254 = vmatpush3.msra.mxu1 %v115_v7  ;;  %v228_v15 = vld [vmem:[%s358_s4] ss:$0 sm:$0xff] }
   0x7   :  { %246 = vmatprep.subr.mxu0 %v268_v0  ;;  %255 = vmatprep.subr.mxu1 %v268_v0  ;;  %v216_v35 = vld [vmem:[%s359_s5] sm:$0xff] }
   0x8   :  { %247 = vmatpush3.msra.mxu0 %v27_v5  ;;  %256 = vmatpush3.msra.mxu1 %v114_v8  ;;  %v218_v37 = vld [vmem:[%s360_s6] sm:$0xff] }
   0x9   :  { %249 = vmatmul.mubr.msk.f32.vlgmr.msra.gmra.mxu0 %vm38_vm1, %v26_v6  ;;  %257 = vmatprep.subr.mxu1 %v268_v0 }
   0xa   :  { %258 = vmatpush3.msra.mxu1 %v113_v9 }
  0xc9   :  { %v108_v11 = vpop.f32.mrf.mxu0 }
  0xca   :  { %v109_v12 = vadd.f32 %v226_v10, %v108_v11 }
  0xcb   :  { %v250_v13 = vpop.f32.mrf.mxu0 }
  0xcc   :  { %v112_v14 = vmax.f32 %v109_v12, 0.0 }
  0xce   :  { %260 = vmatmul.mubr.msk.f32.vlgmr.msra.gmra.mxu1 %vm38_vm1, %v112_v14 }
 0x18e   :  { %v193_v16 = vpop.f32.mrf.mxu1 }
 0x18f   :  { %v194_v17 = vadd.f32 %v228_v15, %v193_v16 }
 0x190   :  { %v261_v18 = vpop.f32.mrf.mxu1 }
 0x191   :  { %v198_v19 = vand.u32 2147483647, %v194_v17  ;;  %v197_v32 = vmax.f32 %v194_v17, 0.0 }
 0x193   :  { %v199_v20 = vsub.f32 0.0, %v198_v19 }
 0x195   :  { %v200_v21 = vmul.f32 1.442695, %v199_v20 }
 0x197   :  { %264 = vpow2.f32 %v200_v21 }
 0x1a4   :  { %v265_v22 = vpop.eup %264 }
 0x1a5   :  { %v202_v23 = vadd.f32 1.0, %v265_v22  ;;  %v205_v24 = vmul.f32 -0.5, %v265_v22  ;;  %v208_v27 = vand.u32 2147483647, %v265_v22 }
 0x1a7   :  { %266 = vlog2.f32 %v202_v23  ;;  %v206_v26 = vadd.f32 1.0, %v205_v24  ;;  %vm209_vm2 = vcmp.lt.f32.partialorder %v208_v27, 0.0004427343 }
 0x1a9   :  { %v207_v31 = vmul.f32 %v265_v22, %v206_v26 }
 0x1b4   :  { %v267_v29 = vpop.eup %266 }
 0x1b5   :  { %v204_v30 = vmul.f32 0.6931472, %v267_v29 }
 0x1b7   :  { %v210_v33 = vsel %vm209_vm2, %v207_v31, %v204_v30 }
 0x1b8   :  { %v211_v34 = vadd.f32 %v210_v33, %v197_v32 }
 0x1ba   :  { %v215_v36 = vsel %vm214_vm3, %v194_v17, %v211_v34 }
 0x1bb   :  { %v217_v38 = vmul.f32 %v216_v35, %v215_v36 }
 0x1bd   :  { %v219_v39 = vadd.f32 %v218_v37, %v217_v38 }
 0x1bf   :  { %221 = vst.msk [vmem:[%s361_s7] sm:$0xff] %vm220_vm4, %v219_v39 }

</bundles_post_ra>
